<compile_context>
chip_gen: v7x
topology: tpu7x:2x2x1
jax: 0.10.0
libtpu: 0.0.40
codegen_flags: <defaults>
</compile_context>

<pallas_src>
import jax
import jax.numpy as jnp
from jax.experimental import pallas as pl
from jax.experimental.pallas import tpu as pltpu

_LANES = 128
_SUBLANES = 8
_NUM_SUMS = 7            # sum_x, sum_y, sum_xy, sum_x2, sum_y2, sum|x-y|, sum(x-y)^2
_MAX_BLOCK_ROWS = 4096   # 4096 x 128 x 4B = 2 MiB per f32 input block
_MAX_SHARDS = 2          # leading "parallel" axis -> both TensorCores on v7x


def _cdiv(a, b):
    return -(-a // b)


def _make_kernel(block_rows, rows, steps_per_shard, ragged):
    groups = block_rows // _SUBLANES

    def _accumulate(acc_ref, x, y):
        d = x - y

        def add(k, v):
            # (block_rows, 128) -> (groups, 8, 128): layout-preserving split of
            # the sublane dim; the sum over the leading dim is pure VPU vreg adds
            # (~1 add per input vreg per statistic).
            acc_ref[0, k] += jnp.sum(
                v.reshape(groups, _SUBLANES, _LANES), axis=0)

        add(0, x)
        add(1, y)
        add(2, x * y)
        add(3, x * x)
        add(4, y * y)
        add(5, jnp.abs(d))
        add(6, d * d)

    def kernel(x_ref, y_ref, acc_ref):
        shard = pl.program_id(0)
        step = pl.program_id(1)

        @pl.when(step == 0)
        def _init():
            acc_ref[...] = jnp.zeros_like(acc_ref)

        x = x_ref[...].astype(jnp.float32)
        y = y_ref[...].astype(jnp.float32)

        if not ragged:
            _accumulate(acc_ref, x, y)
        else:
            # Rows past the end of the real data (Pallas pads the last block
            # with unspecified values) and whole overflow steps of the last
            # shard (their block index was clamped in the index_map) must be
            # zeroed.  Gate the mask behind pl.when so full blocks skip it.
            logical_block = shard * steps_per_shard + step
            valid_rows = rows - logical_block * block_rows

            @pl.when(valid_rows >= block_rows)
            def _full():
                _accumulate(acc_ref, x, y)

            @pl.when(valid_rows < block_rows)
            def _partial():
                row_ids = jax.lax.broadcasted_iota(
                    jnp.int32, (block_rows, _LANES), 0)
                keep = row_ids < valid_rows
                _accumulate(acc_ref,
                            jnp.where(keep, x, 0.0),
                            jnp.where(keep, y, 0.0))

    return kernel


@jax.jit
def l1_pear_mse_loss(x, y):
    assert x.shape == y.shape
    n = x.size  # static

    xf = x.reshape(-1)   # free for contiguous arrays; no dtype cast here
    yf = y.reshape(-1)

    pad = (-n) % (_SUBLANES * _LANES)
    if pad:
        # <= 1023 zeros; they contribute 0 to every accumulated sum and make
        # the (rows, 128) slab exactly (8, 128)-aligned.
        xf = jnp.pad(xf, (0, pad))
        yf = jnp.pad(yf, (0, pad))
    rows = (n + pad) // _LANES          # multiple of 8

    block_rows = min(_MAX_BLOCK_ROWS, rows)
    num_blocks = _cdiv(rows, block_rows)
    num_shards = _MAX_SHARDS if num_blocks >= _MAX_SHARDS else 1
    steps_per_shard = _cdiv(num_blocks, num_shards)
    ragged = (rows % block_rows != 0) or (num_blocks % num_shards != 0)

    x2 = xf.reshape(rows, _LANES)
    y2 = yf.reshape(rows, _LANES)

    last_block = num_blocks - 1

    def in_map(shard, step):
        # Clamp so overflow steps of the last shard re-read an in-bounds block
        # (their contribution is zeroed by the in-kernel mask).
        return (jnp.minimum(shard * steps_per_shard + step, last_block), 0)

    partials = pl.pallas_call(
        _make_kernel(block_rows, rows, steps_per_shard, ragged),
        out_shape=jax.ShapeDtypeStruct(
            (num_shards, _NUM_SUMS, _SUBLANES, _LANES), jnp.float32),
        grid=(num_shards, steps_per_shard),
        in_specs=[
            pl.BlockSpec((block_rows, _LANES), in_map),
            pl.BlockSpec((block_rows, _LANES), in_map),
        ],
        out_specs=pl.BlockSpec(
            (1, _NUM_SUMS, _SUBLANES, _LANES),
            lambda shard, step: (shard, 0, 0, 0)),
        compiler_params=pltpu.CompilerParams(
            dimension_semantics=("parallel", "arbitrary")),
    )(x2, y2)

    # Tiny O(7*8*128) final reduce + scalar combine = glue in plain JAX.
    sums = jnp.sum(partials, axis=(0, 2, 3))  # (7,)
    s_x, s_y, s_xy, s_x2, s_y2, s_abs, s_sq = (sums[k] for k in range(_NUM_SUMS))

    nf = jnp.float32(n)
    l1 = s_abs / nf                      # nn.L1Loss (mean reduction)
    mse = s_sq / nf                      # nn.MSELoss (mean reduction)
    mx = s_x / nf
    my = s_y / nf
    # Pearson_loss via the algebraically equivalent single-pass expansion;
    # clamp the variance sums at 0 to avoid sqrt(negative) from cancellation.
    sum_vxvy = s_xy - nf * mx * my
    sum_vx2 = jnp.maximum(s_x2 - nf * mx * mx, 0.0)
    sum_vy2 = jnp.maximum(s_y2 - nf * my * my, 0.0)
    cost = sum_vxvy / (jnp.sqrt(sum_vx2) * jnp.sqrt(sum_vy2) + jnp.float32(1e-4))
    pearson = jnp.float32(1.0) - cost

    return l1 + pearson + mse


if __name__ == "__main__":
    key = jax.random.PRNGKey(0)
    kx, ky = jax.random.split(key)

    # Pure-JAX reference (mirrors the PyTorch forward exactly).
    def ref(a, b):
        l1 = jnp.mean(jnp.abs(a - b))
        mse = jnp.mean((a - b) ** 2)
        va = a - jnp.mean(a)
        vb = b - jnp.mean(b)
        cost = jnp.sum(va * vb) / (
            jnp.sqrt(jnp.sum(va ** 2)) * jnp.sqrt(jnp.sum(vb ** 2)) + 1e-4
        )
        return l1 + (1.0 - cost) + mse

    # Main check: small NCHW tensors.
    x = jax.random.normal(kx, (2, 4, 16, 16), dtype=jnp.float32)
    y = jax.random.normal(ky, (2, 4, 16, 16), dtype=jnp.float32)
    loss = l1_pear_mse_loss(x, y)
    jax.block_until_ready(loss)
    r = ref(x, y)
    assert jnp.allclose(loss, r, atol=1e-4, rtol=1e-4), (float(loss), float(r))

    # Sanity check on a non-128-aligned shape to exercise the ragged
    # masking / clamped-index path.
    xr = jax.random.normal(kx, (2, 3, 15, 17), dtype=jnp.float32)
    yr = jax.random.normal(ky, (2, 3, 15, 17), dtype=jnp.float32)
    loss_r = l1_pear_mse_loss(xr, yr)
    jax.block_until_ready(loss_r)
    rr = ref(xr, yr)
    assert jnp.allclose(loss_r, rr, atol=1e-4, rtol=1e-4), (float(loss_r), float(rr))

    print("KERNEL_OK")
</pallas_src>

<mosaic_0001>
module attributes {stable_mosaic.version = 11 : i64} {
  func.func @kernel(%arg0: i32, %arg1: i32, %arg2: memref<16x128xf32, #tpu.memory_space<vmem>>, %arg3: memref<16x128xf32, #tpu.memory_space<vmem>>, %arg4: memref<1x7x8x128xf32, #tpu.memory_space<vmem>>) attributes {dimension_semantics = [#tpu.dimension_semantics<parallel>, #tpu.dimension_semantics<arbitrary>], iteration_bounds = array<i64: 1, 1>, scalar_prefetch = 0 : i64, scratch_operands = 0 : i64, tpu.core_type = #tpu.core_type<tc>, window_params = [{transform_indices = @transform_0, window_bounds = array<i64: 16, 128>}, {transform_indices = @transform_1, window_bounds = array<i64: 16, 128>}, {transform_indices = @transform_2, window_bounds = array<i64: 1, 7, 8, 128>}]} {
    %c0_i32 = arith.constant 0 : i32
    %0 = arith.cmpi eq, %arg1, %c0_i32 : i32
    %1 = arith.extui %0 : i1 to i32
    %c0_i32_0 = arith.constant 0 : i32
    %2 = arith.cmpi ne, %1, %c0_i32_0 : i32
    scf.if %2 {
      %cst_60 = arith.constant 0.000000e+00 : f32
      %67 = vector.broadcast %cst_60 : f32 to vector<1x7x8x128xf32>
      %c0_61 = arith.constant 0 : index
      %c0_62 = arith.constant 0 : index
      %c0_63 = arith.constant 0 : index
      %c0_64 = arith.constant 0 : index
      %68 = vector.load %arg4[%c0_61, %c0_62, %c0_63, %c0_64] : memref<1x7x8x128xf32, #tpu.memory_space<vmem>>, vector<1x7x8x128xf32>
      tpu.vector_store %arg4[%c0_61, %c0_62, %c0_63, %c0_64], %67 {strides = array<i32>} : memref<1x7x8x128xf32, #tpu.memory_space<vmem>>, vector<1x7x8x128xf32>,
    } else {
    }
    %c0 = arith.constant 0 : index
    %c0_1 = arith.constant 0 : index
    %3 = vector.load %arg2[%c0, %c0_1] : memref<16x128xf32, #tpu.memory_space<vmem>>, vector<16x128xf32>
    %c0_2 = arith.constant 0 : index
    %c0_3 = arith.constant 0 : index
    %4 = vector.load %arg3[%c0_2, %c0_3] : memref<16x128xf32, #tpu.memory_space<vmem>>, vector<16x128xf32>
    %5 = arith.subf %3, %4 : vector<16x128xf32>
    %c0_4 = arith.constant 0 : index
    %c0_5 = arith.constant 0 : index
    %c0_6 = arith.constant 0 : index
    %c0_7 = arith.constant 0 : index
    %6 = vector.load %arg4[%c0_4, %c0_5, %c0_6, %c0_7] : memref<1x7x8x128xf32, #tpu.memory_space<vmem>>, vector<1x1x8x128xf32>
    %7 = vector.shape_cast %6 : vector<1x1x8x128xf32> to vector<8x128xf32>
    %8 = vector.shape_cast %3 : vector<16x128xf32> to vector<2x8x128xf32>
    %cst = arith.constant dense<0.000000e+00> : vector<8x128xf32>
    %9 = vector.multi_reduction <add>, %8, %cst [0] : vector<2x8x128xf32> to vector<8x128xf32>
    %10 = arith.addf %7, %9 : vector<8x128xf32>
    %c0_8 = arith.constant 0 : index
    %c0_9 = arith.constant 0 : index
    %c0_10 = arith.constant 0 : index
    %c0_11 = arith.constant 0 : index
    %11 = vector.load %arg4[%c0_8, %c0_9, %c0_10, %c0_11] : memref<1x7x8x128xf32, #tpu.memory_space<vmem>>, vector<1x1x8x128xf32>
    %12 = vector.shape_cast %11 : vector<1x1x8x128xf32> to vector<8x128xf32>
    %13 = vector.shape_cast %10 : vector<8x128xf32> to vector<1x1x8x128xf32>
    tpu.vector_store %arg4[%c0_8, %c0_9, %c0_10, %c0_11], %13 {strides = array<i32>} : memref<1x7x8x128xf32, #tpu.memory_space<vmem>>, vector<1x1x8x128xf32>,
    %c0_12 = arith.constant 0 : index
    %c1 = arith.constant 1 : index
    %c0_13 = arith.constant 0 : index
    %c0_14 = arith.constant 0 : index
    %14 = vector.load %arg4[%c0_12, %c1, %c0_13, %c0_14] : memref<1x7x8x128xf32, #tpu.memory_space<vmem>>, vector<1x1x8x128xf32>
    %15 = vector.shape_cast %14 : vector<1x1x8x128xf32> to vector<8x128xf32>
    %16 = vector.shape_cast %4 : vector<16x128xf32> to vector<2x8x128xf32>
    %cst_15 = arith.constant dense<0.000000e+00> : vector<8x128xf32>
    %17 = vector.multi_reduction <add>, %16, %cst_15 [0] : vector<2x8x128xf32> to vector<8x128xf32>
    %18 = arith.addf %15, %17 : vector<8x128xf32>
    %c0_16 = arith.constant 0 : index
    %c1_17 = arith.constant 1 : index
    %c0_18 = arith.constant 0 : index
    %c0_19 = arith.constant 0 : index
    %19 = vector.load %arg4[%c0_16, %c1_17, %c0_18, %c0_19] : memref<1x7x8x128xf32, #tpu.memory_space<vmem>>, vector<1x1x8x128xf32>
    %20 = vector.shape_cast %19 : vector<1x1x8x128xf32> to vector<8x128xf32>
    %21 = vector.shape_cast %18 : vector<8x128xf32> to vector<1x1x8x128xf32>
    tpu.vector_store %arg4[%c0_16, %c1_17, %c0_18, %c0_19], %21 {strides = array<i32>} : memref<1x7x8x128xf32, #tpu.memory_space<vmem>>, vector<1x1x8x128xf32>,
    %22 = arith.mulf %3, %4 : vector<16x128xf32>
    %c0_20 = arith.constant 0 : index
    %c2 = arith.constant 2 : index
    %c0_21 = arith.constant 0 : index
    %c0_22 = arith.constant 0 : index
    %23 = vector.load %arg4[%c0_20, %c2, %c0_21, %c0_22] : memref<1x7x8x128xf32, #tpu.memory_space<vmem>>, vector<1x1x8x128xf32>
    %24 = vector.shape_cast %23 : vector<1x1x8x128xf32> to vector<8x128xf32>
    %25 = vector.shape_cast %22 : vector<16x128xf32> to vector<2x8x128xf32>
    %cst_23 = arith.constant dense<0.000000e+00> : vector<8x128xf32>
    %26 = vector.multi_reduction <add>, %25, %cst_23 [0] : vector<2x8x128xf32> to vector<8x128xf32>
    %27 = arith.addf %24, %26 : vector<8x128xf32>
    %c0_24 = arith.constant 0 : index
    %c2_25 = arith.constant 2 : index
    %c0_26 = arith.constant 0 : index
    %c0_27 = arith.constant 0 : index
    %28 = vector.load %arg4[%c0_24, %c2_25, %c0_26, %c0_27] : memref<1x7x8x128xf32, #tpu.memory_space<vmem>>, vector<1x1x8x128xf32>
    %29 = vector.shape_cast %28 : vector<1x1x8x128xf32> to vector<8x128xf32>
    %30 = vector.shape_cast %27 : vector<8x128xf32> to vector<1x1x8x128xf32>
    tpu.vector_store %arg4[%c0_24, %c2_25, %c0_26, %c0_27], %30 {strides = array<i32>} : memref<1x7x8x128xf32, #tpu.memory_space<vmem>>, vector<1x1x8x128xf32>,
    %31 = arith.mulf %3, %3 : vector<16x128xf32>
    %c0_28 = arith.constant 0 : index
    %c3 = arith.constant 3 : index
    %c0_29 = arith.constant 0 : index
    %c0_30 = arith.constant 0 : index
    %32 = vector.load %arg4[%c0_28, %c3, %c0_29, %c0_30] : memref<1x7x8x128xf32, #tpu.memory_space<vmem>>, vector<1x1x8x128xf32>
    %33 = vector.shape_cast %32 : vector<1x1x8x128xf32> to vector<8x128xf32>
    %34 = vector.shape_cast %31 : vector<16x128xf32> to vector<2x8x128xf32>
    %cst_31 = arith.constant dense<0.000000e+00> : vector<8x128xf32>
    %35 = vector.multi_reduction <add>, %34, %cst_31 [0] : vector<2x8x128xf32> to vector<8x128xf32>
    %36 = arith.addf %33, %35 : vector<8x128xf32>
    %c0_32 = arith.constant 0 : index
    %c3_33 = arith.constant 3 : index
    %c0_34 = arith.constant 0 : index
    %c0_35 = arith.constant 0 : index
    %37 = vector.load %arg4[%c0_32, %c3_33, %c0_34, %c0_35] : memref<1x7x8x128xf32, #tpu.memory_space<vmem>>, vector<1x1x8x128xf32>
    %38 = vector.shape_cast %37 : vector<1x1x8x128xf32> to vector<8x128xf32>
    %39 = vector.shape_cast %36 : vector<8x128xf32> to vector<1x1x8x128xf32>
    tpu.vector_store %arg4[%c0_32, %c3_33, %c0_34, %c0_35], %39 {strides = array<i32>} : memref<1x7x8x128xf32, #tpu.memory_space<vmem>>, vector<1x1x8x128xf32>,
    %40 = arith.mulf %4, %4 : vector<16x128xf32>
    %c0_36 = arith.constant 0 : index
    %c4 = arith.constant 4 : index
    %c0_37 = arith.constant 0 : index
    %c0_38 = arith.constant 0 : index
    %41 = vector.load %arg4[%c0_36, %c4, %c0_37, %c0_38] : memref<1x7x8x128xf32, #tpu.memory_space<vmem>>, vector<1x1x8x128xf32>
    %42 = vector.shape_cast %41 : vector<1x1x8x128xf32> to vector<8x128xf32>
    %43 = vector.shape_cast %40 : vector<16x128xf32> to vector<2x8x128xf32>
    %cst_39 = arith.constant dense<0.000000e+00> : vector<8x128xf32>
    %44 = vector.multi_reduction <add>, %43, %cst_39 [0] : vector<2x8x128xf32> to vector<8x128xf32>
    %45 = arith.addf %42, %44 : vector<8x128xf32>
    %c0_40 = arith.constant 0 : index
    %c4_41 = arith.constant 4 : index
    %c0_42 = arith.constant 0 : index
    %c0_43 = arith.constant 0 : index
    %46 = vector.load %arg4[%c0_40, %c4_41, %c0_42, %c0_43] : memref<1x7x8x128xf32, #tpu.memory_space<vmem>>, vector<1x1x8x128xf32>
    %47 = vector.shape_cast %46 : vector<1x1x8x128xf32> to vector<8x128xf32>
    %48 = vector.shape_cast %45 : vector<8x128xf32> to vector<1x1x8x128xf32>
    tpu.vector_store %arg4[%c0_40, %c4_41, %c0_42, %c0_43], %48 {strides = array<i32>} : memref<1x7x8x128xf32, #tpu.memory_space<vmem>>, vector<1x1x8x128xf32>,
    %49 = math.absf %5 : vector<16x128xf32>
    %c0_44 = arith.constant 0 : index
    %c5 = arith.constant 5 : index
    %c0_45 = arith.constant 0 : index
    %c0_46 = arith.constant 0 : index
    %50 = vector.load %arg4[%c0_44, %c5, %c0_45, %c0_46] : memref<1x7x8x128xf32, #tpu.memory_space<vmem>>, vector<1x1x8x128xf32>
    %51 = vector.shape_cast %50 : vector<1x1x8x128xf32> to vector<8x128xf32>
    %52 = vector.shape_cast %49 : vector<16x128xf32> to vector<2x8x128xf32>
    %cst_47 = arith.constant dense<0.000000e+00> : vector<8x128xf32>
    %53 = vector.multi_reduction <add>, %52, %cst_47 [0] : vector<2x8x128xf32> to vector<8x128xf32>
    %54 = arith.addf %51, %53 : vector<8x128xf32>
    %c0_48 = arith.constant 0 : index
    %c5_49 = arith.constant 5 : index
    %c0_50 = arith.constant 0 : index
    %c0_51 = arith.constant 0 : index
    %55 = vector.load %arg4[%c0_48, %c5_49, %c0_50, %c0_51] : memref<1x7x8x128xf32, #tpu.memory_space<vmem>>, vector<1x1x8x128xf32>
    %56 = vector.shape_cast %55 : vector<1x1x8x128xf32> to vector<8x128xf32>
    %57 = vector.shape_cast %54 : vector<8x128xf32> to vector<1x1x8x128xf32>
    tpu.vector_store %arg4[%c0_48, %c5_49, %c0_50, %c0_51], %57 {strides = array<i32>} : memref<1x7x8x128xf32, #tpu.memory_space<vmem>>, vector<1x1x8x128xf32>,
    %58 = arith.mulf %5, %5 : vector<16x128xf32>
    %c0_52 = arith.constant 0 : index
    %c6 = arith.constant 6 : index
    %c0_53 = arith.constant 0 : index
    %c0_54 = arith.constant 0 : index
    %59 = vector.load %arg4[%c0_52, %c6, %c0_53, %c0_54] : memref<1x7x8x128xf32, #tpu.memory_space<vmem>>, vector<1x1x8x128xf32>
    %60 = vector.shape_cast %59 : vector<1x1x8x128xf32> to vector<8x128xf32>
    %61 = vector.shape_cast %58 : vector<16x128xf32> to vector<2x8x128xf32>
    %cst_55 = arith.constant dense<0.000000e+00> : vector<8x128xf32>
    %62 = vector.multi_reduction <add>, %61, %cst_55 [0] : vector<2x8x128xf32> to vector<8x128xf32>
    %63 = arith.addf %60, %62 : vector<8x128xf32>
    %c0_56 = arith.constant 0 : index
    %c6_57 = arith.constant 6 : index
    %c0_58 = arith.constant 0 : index
    %c0_59 = arith.constant 0 : index
    %64 = vector.load %arg4[%c0_56, %c6_57, %c0_58, %c0_59] : memref<1x7x8x128xf32, #tpu.memory_space<vmem>>, vector<1x1x8x128xf32>
    %65 = vector.shape_cast %64 : vector<1x1x8x128xf32> to vector<8x128xf32>
    %66 = vector.shape_cast %63 : vector<8x128xf32> to vector<1x1x8x128xf32>
    tpu.vector_store %arg4[%c0_56, %c6_57, %c0_58, %c0_59], %66 {strides = array<i32>} : memref<1x7x8x128xf32, #tpu.memory_space<vmem>>, vector<1x1x8x128xf32>,
    return
  }
  func.func @transform_0(%arg0: i32, %arg1: i32) -> (i32, i32) {
    %c1_i32 = arith.constant 1 : i32
    %0 = arith.muli %arg0, %c1_i32 : i32
    %1 = arith.addi %0, %arg1 : i32
    %c0_i32 = arith.constant 0 : i32
    %2 = arith.minsi %1, %c0_i32 : i32
    %c0_i32_0 = arith.constant 0 : i32
    %c0_i32_1 = arith.constant 0 : i32
    return %2, %c0_i32_0 : i32, i32
  }
  func.func @transform_1(%arg0: i32, %arg1: i32) -> (i32, i32) {
    %c1_i32 = arith.constant 1 : i32
    %0 = arith.muli %arg0, %c1_i32 : i32
    %1 = arith.addi %0, %arg1 : i32
    %c0_i32 = arith.constant 0 : i32
    %2 = arith.minsi %1, %c0_i32 : i32
    %c0_i32_0 = arith.constant 0 : i32
    %c0_i32_1 = arith.constant 0 : i32
    return %2, %c0_i32_0 : i32, i32
  }
  func.func @transform_2(%arg0: i32, %arg1: i32) -> (i32, i32, i32, i32) {
    %c0_i32 = arith.constant 0 : i32
    %c0_i32_0 = arith.constant 0 : i32
    %c0_i32_1 = arith.constant 0 : i32
    %c0_i32_2 = arith.constant 0 : i32
    return %arg0, %c0_i32, %c0_i32_0, %c0_i32_1 : i32, i32, i32, i32
  }
}

</mosaic_0001>

<bundles_post_ra>
// kernel: l1_pear_mse_loss.1
= control target key start
LH: loop header
LB: loop body
LE: loop exit
PB: predicated region body
PF: predicated region fallthrough
CT: control target
= control target key end

     0   :  { %s213_s0 = inlined_call_operand.vmem [shape: f32[16,128], index: 0, kind: input, shape index: {}]   ;;  %s214_s1 = inlined_call_operand.vmem [shape: f32[16,128], index: 1, kind: input, shape index: {}]   ;;  %s215_s2 = inlined_call_operand.vmem [shape: f32[1,7,8,128], index: 2, kind: output, shape index: {}]  }
   0x1   :  { %v86_v0 = vld [vmem:[%s213_s0] sm:$0xff]  ;;  %v87_v1 = vld [vmem:[%s213_s0 + $0x8] sm:$0xff] }
   0x2   :  { %v88_v2 = vld [vmem:[%s214_s1] sm:$0xff]  ;;  %v93_v3 = vadd.f32 %v87_v1, %v86_v0  ;;  %v89_v4 = vld [vmem:[%s214_s1 + $0x8] sm:$0xff]  ;;  %v108_v6 = vmul.f32 %v86_v0, %v86_v0  ;;  %v109_v7 = vmul.f32 %v87_v1, %v87_v1 }
   0x3   :  { %v101_v5 = vmul.f32 %v88_v2, %v86_v0  ;;  %v98_v8 = vadd.f32 %v89_v4, %v88_v2  ;;  %v102_v9 = vmul.f32 %v89_v4, %v87_v1  ;;  %v115_v10 = vmul.f32 %v88_v2, %v88_v2 }
   0x4   :  { %v116_v11 = vmul.f32 %v89_v4, %v89_v4  ;;  %v112_v12 = vadd.f32 %v109_v7, %v108_v6  ;;  %v90_v13 = vsub.f32 %v86_v0, %v88_v2  ;;  %v91_v14 = vsub.f32 %v87_v1, %v89_v4  ;;  %95 = vst [vmem:[%s215_s2] sm:$0xff] %v93_v3 }
   0x5   :  { %v105_v15 = vadd.f32 %v102_v9, %v101_v5  ;;  %153 = vst [vmem:[%s215_s2 + $0x8] sm:$0xff] %v98_v8 }
   0x6   :  { %v119_v16 = vadd.f32 %v116_v11, %v115_v10  ;;  %v122_v17 = vand.u32 2147483647, %v90_v13  ;;  %v123_v18 = vand.u32 2147483647, %v91_v14  ;;  %v129_v19 = vmul.f32 %v90_v13, %v90_v13  ;;  %157 = vst [vmem:[%s215_s2 + $0x18] sm:$0xff] %v112_v12 }
   0x7   :  { %v130_v20 = vmul.f32 %v91_v14, %v91_v14  ;;  %155 = vst [vmem:[%s215_s2 + $0x10] sm:$0xff] %v105_v15 }
   0x8   :  { %v126_v21 = vadd.f32 %v123_v18, %v122_v17  ;;  %159 = vst [vmem:[%s215_s2 + $0x20] sm:$0xff] %v119_v16 }
   0x9   :  { %v133_v22 = vadd.f32 %v130_v20, %v129_v19 }
   0xa   :  { %161 = vst [vmem:[%s215_s2 + $0x28] sm:$0xff] %v126_v21 }
   0xb   :  { %163 = vst [vmem:[%s215_s2 + $0x30] sm:$0xff] %v133_v22 }

</bundles_post_ra>
